<compile_context>
chip_gen: v6e
topology: v6e:2x2x1
jax: 0.10.0
libtpu: 0.0.40
codegen_flags: <defaults>
</compile_context>

<pallas_src>
import functools

import jax
import jax.numpy as jnp
from jax import lax
from jax.experimental import pallas as pl
from jax.experimental.pallas import tpu as pltpu

_LANES = 128
_SUBLANES = 8
_MAX_ROW_TILE = 2048


def _round_up(x, n):
    return ((x + n - 1) // n) * n


def _vmem_limit_bytes():
    """Generation-aware VMEM ceiling: ~3/4 of physical VMEM (128 MiB on v5e/v6e
    -> 96 MiB, 64 MiB per-core on v7x -> 48 MiB).  Falls back to the v7x-safe
    48 MiB if the hardware query is unavailable."""
    phys = 64 * 1024 * 1024
    try:
        phys = int(pltpu.get_tpu_info().vmem_capacity_bytes)
    except Exception:
        pass
    return min((phys * 3) // 4, 100 * 1024 * 1024)


def _block_spec(block_shape, index_map, buffers=None):
    """BlockSpec with an optional buffer-count hint (pl.Buffered); falls back to
    a plain BlockSpec if this JAX version does not accept pipeline_mode."""
    if buffers is not None:
        try:
            return pl.BlockSpec(block_shape, index_map,
                                pipeline_mode=pl.Buffered(buffers))
        except (TypeError, AttributeError):
            pass
    return pl.BlockSpec(block_shape, index_map)


def _head_kernel_small_c(x_ref, w_ref, b_ref, o_ref, *, compute_dtype):
    # x_ref: (TM, H)  streamed row tile of the flattened sequence output
    # w_ref: (Cp8, H) VMEM-resident decoder weight (classes padded to 8 sublanes)
    # b_ref: (Cp8, 1) VMEM-resident decoder bias
    # o_ref: (Cp8, TM) transposed logits tile -> lane axis is TM (lane-dense stores)
    x = x_ref[...]
    w = w_ref[...]
    if compute_dtype is not None:
        x = x.astype(compute_dtype)
        w = w.astype(compute_dtype)
    acc = lax.dot_general(
        w, x,
        dimension_numbers=(((1,), (1,)), ((), ())),   # contract over H
        preferred_element_type=jnp.float32,
    )
    o_ref[...] = (acc + b_ref[...].astype(jnp.float32)).astype(o_ref.dtype)


def _head_kernel_wide_c(x_ref, w_ref, b_ref, o_ref, *, compute_dtype):
    # x_ref: (TM, H); w_ref: (Cp, H); b_ref: (1, Cp); o_ref: (TM, Cp)
    x = x_ref[...]
    w = w_ref[...]
    if compute_dtype is not None:
        x = x.astype(compute_dtype)
        w = w.astype(compute_dtype)
    acc = lax.dot_general(
        x, w,
        dimension_numbers=(((1,), (1,)), ((), ())),   # contract over H
        preferred_element_type=jnp.float32,
    )
    o_ref[...] = (acc + b_ref[...].astype(jnp.float32)).astype(o_ref.dtype)


class TemporalPredictionHead:
    """Pallas-TPU forward pass of the PyTorch TemporalPredictionHead."""

    def __init__(self, weight, bias, lambd=1.0, compute_dtype=None):
        # weight: (C, H), bias: (C,).  `lambd` only affects the (unimplemented)
        # backward pass of GradientReversal; the forward pass is the identity.
        self.lambd = lambd
        self._compute_dtype = compute_dtype
        num_classes, hidden = weight.shape
        self._num_classes = int(num_classes)
        self._hidden = int(hidden)

        cp8 = _round_up(self._num_classes, _SUBLANES)
        self._small_c = cp8 < _LANES
        self._cp = cp8 if self._small_c else _round_up(self._num_classes, _LANES)

        # Parameter padding is done ONCE here (hoisted out of the per-call path).
        w_pad = jnp.zeros((self._cp, hidden), weight.dtype)
        w_pad = w_pad.at[:num_classes, :].set(weight)
        if self._small_c:
            b_pad = jnp.zeros((self._cp, 1), bias.dtype)
            b_pad = b_pad.at[:num_classes, 0].set(bias)
        else:
            b_pad = jnp.zeros((1, self._cp), bias.dtype)
            b_pad = b_pad.at[0, :num_classes].set(bias)
        self._w_pad = w_pad
        self._b_pad = b_pad

        self._vmem_limit = _vmem_limit_bytes()
        self._use_buffer_hint = hasattr(pl, "Buffered")

    # -- tiling ---------------------------------------------------------------

    def _pick_row_tile(self, m, x_itemsize, out_itemsize):
        hidden, cp = self._hidden, self._cp
        w_bytes = cp * hidden * self._w_pad.dtype.itemsize
        b_bytes = cp * self._b_pad.dtype.itemsize
        # Budget: ~3/4 of the VMEM ceiling minus the resident weight/bias
        # (counted at 2 buffers in case single-buffering is unavailable) and
        # slack for Mosaic-internal scratch.
        budget = (self._vmem_limit * 3) // 4 - 2 * (w_bytes + b_bytes) - (2 << 20)
        # Output tile is (cp, TM) or (TM, cp): same bytes per row either way.
        per_row = 2 * hidden * x_itemsize + 2 * cp * out_itemsize
        tm = max(budget // max(per_row, 1), _LANES)
        tm = min(tm, _MAX_ROW_TILE)
        # Multiple of 128: lane-dense stores on the small-C (transposed) path and
        # automatically >= the f32/bf16/int8 sublane multiples (8/16/32).
        tm = max((tm // _LANES) * _LANES, _LANES)
        if m <= tm:
            if m >= 1024:
                # Keep >= 2 grid steps so v7x's two TensorCores can both work
                # the "parallel" row axis (near-neutral on single-TC v5e/v6e).
                tm = _round_up(pl.cdiv(m, 2), _LANES)
            else:
                tm = m        # single block equal to the full extent (legal)
        return int(tm)

    # -- forward --------------------------------------------------------------

    def __call__(self, sequence_output):
        orig_shape = sequence_output.shape
        hidden = orig_shape[-1]
        if hidden != self._hidden:
            raise ValueError(f"expected hidden={self._hidden}, got {hidden}")
        out_dtype = sequence_output.dtype

        x2d = sequence_output.reshape(-1, hidden)          # (M, H)
        m = x2d.shape[0]
        tm = self._pick_row_tile(m, x2d.dtype.itemsize,
                                 jnp.dtype(out_dtype).itemsize)
        grid = (pl.cdiv(m, tm),)                           # ragged edge handled by Pallas

        try:
            out = self._run(x2d, m, tm, grid, out_dtype, self._use_buffer_hint)
        except Exception:
            if not self._use_buffer_hint:
                raise
            # This Mosaic build rejected the single-buffer hint on the invariant
            # weight/bias; retry once without it (identical semantics).
            self._use_buffer_hint = False
            out = self._run(x2d, m, tm, grid, out_dtype, False)

        c = self._num_classes
        if self._small_c:
            logits2d = out[:c, :].T                        # tiny (C, M) -> (M, C)
        else:
            logits2d = out[:, :c]
        return logits2d.reshape(*orig_shape[:-1], c)

    def _run(self, x2d, m, tm, grid, out_dtype, use_buffer_hint):
        hidden, cp, c = self._hidden, self._cp, self._num_classes
        param_buffers = 1 if use_buffer_hint else None

        x_spec = pl.BlockSpec((tm, hidden), lambda i: (i, 0))   # streamed row tiles
        w_spec = _block_spec((cp, hidden), lambda i: (0, 0), buffers=param_buffers)
        if self._small_c:
            kernel = functools.partial(_head_kernel_small_c,
                                       compute_dtype=self._compute_dtype)
            b_spec = _block_spec((cp, 1), lambda i: (0, 0), buffers=param_buffers)
            out_spec = pl.BlockSpec((cp, tm), lambda i: (0, i))  # lane axis = rows
            out_shape = jax.ShapeDtypeStruct((cp, m), out_dtype)
        else:
            kernel = functools.partial(_head_kernel_wide_c,
                                       compute_dtype=self._compute_dtype)
            b_spec = _block_spec((1, cp), lambda i: (0, 0), buffers=param_buffers)
            out_spec = pl.BlockSpec((tm, cp), lambda i: (i, 0))
            out_shape = jax.ShapeDtypeStruct((m, cp), out_dtype)

        cost = pl.CostEstimate(                 # true (unpadded) sizes, advisory
            flops=2 * m * hidden * c,
            transcendentals=0,
            bytes_accessed=(m * hidden * x2d.dtype.itemsize
                            + c * hidden * self._w_pad.dtype.itemsize
                            + m * c * jnp.dtype(out_dtype).itemsize),
        )

        return pl.pallas_call(
            kernel,
            out_shape=out_shape,
            grid_spec=pltpu.PrefetchScalarGridSpec(
                num_scalar_prefetch=0,
                grid=grid,
                in_specs=[x_spec, w_spec, b_spec],
                out_specs=out_spec,
            ),
            compiler_params=pltpu.CompilerParams(
                dimension_semantics=("parallel",),     # shards rows across v7x's 2 TCs
                vmem_limit_bytes=int(self._vmem_limit),
            ),
            cost_estimate=cost,
        )(x2d, self._w_pad, self._b_pad)


if __name__ == "__main__":
    # Small config consistent with the module.
    batch, seq, hidden = 2, 8, 32
    num_temporal_classes = 4
    lambd = 1.0   # only affects the (unimplemented) backward gradient reversal

    key = jax.random.PRNGKey(0)
    k_x, k_w, k_b = jax.random.split(key, 3)

    sequence_output = jax.random.normal(k_x, (batch, seq, hidden), dtype=jnp.float32)
    bound = 1.0 / (hidden ** 0.5)   # nn.Linear-style init
    weight = jax.random.uniform(k_w, (num_temporal_classes, hidden),
                                minval=-bound, maxval=bound, dtype=jnp.float32)
    bias = jax.random.uniform(k_b, (num_temporal_classes,),
                              minval=-bound, maxval=bound, dtype=jnp.float32)

    head = TemporalPredictionHead(weight, bias, lambd=lambd)
    logits = head(sequence_output)
    jax.block_until_ready(logits)

    ref = sequence_output @ weight.T + bias
    assert logits.shape == (batch, seq, num_temporal_classes)
    assert jnp.allclose(logits, ref, atol=1e-5, rtol=1e-5)

    # Larger, multi-tile M with a ragged edge (no activation padding path).
    big_x = jax.random.normal(key, (4, 700, hidden), dtype=jnp.float32)
    big_out = head(big_x)
    jax.block_until_ready(big_out)
    assert jnp.allclose(big_out, big_x @ weight.T + bias, atol=1e-5, rtol=1e-5)

    # Wide-class configuration exercises the (M, Cp) lane-dense layout.
    k_w2, k_b2 = jax.random.split(jax.random.PRNGKey(1))
    wide_classes = 256
    w2 = jax.random.uniform(k_w2, (wide_classes, hidden),
                            minval=-bound, maxval=bound, dtype=jnp.float32)
    b2 = jax.random.uniform(k_b2, (wide_classes,),
                            minval=-bound, maxval=bound, dtype=jnp.float32)
    head_wide = TemporalPredictionHead(w2, b2, lambd=lambd)
    wide_out = head_wide(sequence_output)
    jax.block_until_ready(wide_out)
    assert jnp.allclose(wide_out, sequence_output @ w2.T + b2, atol=1e-5, rtol=1e-5)

    print("KERNEL_OK")
</pallas_src>

<mosaic_0001>
module attributes {stable_mosaic.version = 11 : i64} {
  func.func @_head_kernel_small_c(%arg0: i32, %arg1: memref<16x32xf32, #tpu.memory_space<vmem>>, %arg2: memref<8x32xf32, #tpu.memory_space<vmem>>, %arg3: memref<8x1xf32, #tpu.memory_space<vmem>>, %arg4: memref<8x16xf32, #tpu.memory_space<vmem>>) attributes {dimension_semantics = [#tpu.dimension_semantics<parallel>], iteration_bounds = array<i64: 1>, scalar_prefetch = 0 : i64, scratch_operands = 0 : i64, tpu.core_type = #tpu.core_type<tc>, window_params = [{transform_indices = @transform_0, window_bounds = array<i64: 16, 32>}, {pipeline_mode = #tpu.pipeline_mode<synchronous>, transform_indices = @transform_1, window_bounds = array<i64: 8, 32>}, {pipeline_mode = #tpu.pipeline_mode<synchronous>, transform_indices = @transform_2, window_bounds = array<i64: 8, 1>}, {transform_indices = @transform_3, window_bounds = array<i64: 8, 16>}]} {
    %c0 = arith.constant 0 : index
    %c0_0 = arith.constant 0 : index
    %0 = vector.load %arg1[%c0, %c0_0] : memref<16x32xf32, #tpu.memory_space<vmem>>, vector<16x32xf32>
    %c0_1 = arith.constant 0 : index
    %c0_2 = arith.constant 0 : index
    %1 = vector.load %arg2[%c0_1, %c0_2] : memref<8x32xf32, #tpu.memory_space<vmem>>, vector<8x32xf32>
    %cst = arith.constant dense<0.000000e+00> : vector<8x16xf32>
    %2 = tpu.matmul %1, %0, %cst {dimension_numbers = #tpu.dot_dimension_numbers<[1], [1], [0], [0], [0, 0, 1, 0], [], []>} : vector<8x32xf32>, vector<16x32xf32>, vector<8x16xf32> -> vector<8x16xf32>
    %c0_3 = arith.constant 0 : index
    %c0_4 = arith.constant 0 : index
    %3 = vector.load %arg3[%c0_3, %c0_4] : memref<8x1xf32, #tpu.memory_space<vmem>>, vector<8x1xf32>
    %4 = vector.broadcast %3 : vector<8x1xf32> to vector<8x16xf32>
    %5 = arith.addf %2, %4 : vector<8x16xf32>
    %c0_5 = arith.constant 0 : index
    %c0_6 = arith.constant 0 : index
    %6 = vector.load %arg4[%c0_5, %c0_6] : memref<8x16xf32, #tpu.memory_space<vmem>>, vector<8x16xf32>
    tpu.vector_store %arg4[%c0_5, %c0_6], %5 {strides = array<i32>} : memref<8x16xf32, #tpu.memory_space<vmem>>, vector<8x16xf32>,
    return
  }
  func.func @transform_0(%arg0: i32) -> (i32, i32) {
    %c0_i32 = arith.constant 0 : i32
    %c0_i32_0 = arith.constant 0 : i32
    return %arg0, %c0_i32 : i32, i32
  }
  func.func @transform_1(%arg0: i32) -> (i32, i32) {
    %c0_i32 = arith.constant 0 : i32
    %c0_i32_0 = arith.constant 0 : i32
    %c0_i32_1 = arith.constant 0 : i32
    return %c0_i32, %c0_i32_0 : i32, i32
  }
  func.func @transform_2(%arg0: i32) -> (i32, i32) {
    %c0_i32 = arith.constant 0 : i32
    %c0_i32_0 = arith.constant 0 : i32
    %c0_i32_1 = arith.constant 0 : i32
    return %c0_i32, %c0_i32_0 : i32, i32
  }
  func.func @transform_3(%arg0: i32) -> (i32, i32) {
    %c0_i32 = arith.constant 0 : i32
    %c0_i32_0 = arith.constant 0 : i32
    return %c0_i32, %arg0 : i32, i32
  }
}

module attributes {stable_mosaic.version = 11 : i64} {
  func.func @_head_kernel_small_c(%arg0: i32, %arg1: memref<16x32xf32, #tpu.memory_space<vmem>>, %arg2: memref<8x32xf32, #tpu.memory_space<vmem>>, %arg3: memref<8x1xf32, #tpu.memory_space<vmem>>, %arg4: memref<8x16xf32, #tpu.memory_space<vmem>>) attributes {dimension_semantics = [#tpu.dimension_semantics<parallel>], iteration_bounds = array<i64: 1>, scalar_prefetch = 0 : i64, scratch_operands = 0 : i64, tpu.core_type = #tpu.core_type<tc>, window_params = [{transform_indices = @transform_0, window_bounds = array<i64: 16, 32>}, {pipeline_mode = #tpu.pipeline_mode<synchronous>, transform_indices = @transform_1, window_bounds = array<i64: 8, 32>}, {pipeline_mode = #tpu.pipeline_mode<synchronous>, transform_indices = @transform_2, window_bounds = array<i64: 8, 1>}, {transform_indices = @transform_3, window_bounds = array<i64: 8, 16>}]} {
    %c0 = arith.constant 0 : index
    %c0_0 = arith.constant 0 : index
    %0 = vector.load %arg1[%c0, %c0_0] : memref<16x32xf32, #tpu.memory_space<vmem>>, vector<16x32xf32>
    %c0_1 = arith.constant 0 : index
    %c0_2 = arith.constant 0 : index
    %1 = vector.load %arg2[%c0_1, %c0_2] : memref<8x32xf32, #tpu.memory_space<vmem>>, vector<8x32xf32>
    %cst = arith.constant dense<0.000000e+00> : vector<8x16xf32>
    %2 = tpu.matmul %1, %0, %cst {dimension_numbers = #tpu.dot_dimension_numbers<[1], [1], [0], [0], [0, 0, 1, 0], [], []>} : vector<8x32xf32>, vector<16x32xf32>, vector<8x16xf32> -> vector<8x16xf32>
    %c0_3 = arith.constant 0 : index
    %c0_4 = arith.constant 0 : index
    %3 = vector.load %arg3[%c0_3, %c0_4] : memref<8x1xf32, #tpu.memory_space<vmem>>, vector<8x1xf32>
    %4 = vector.broadcast %3 : vector<8x1xf32> to vector<8x16xf32>
    %5 = arith.addf %2, %4 : vector<8x16xf32>
    %c0_5 = arith.constant 0 : index
    %c0_6 = arith.constant 0 : index
    %6 = vector.load %arg4[%c0_5, %c0_6] : memref<8x16xf32, #tpu.memory_space<vmem>>, vector<8x16xf32>
    tpu.vector_store %arg4[%c0_5, %c0_6], %5 {strides = array<i32>} : memref<8x16xf32, #tpu.memory_space<vmem>>, vector<8x16xf32>,
    return
  }
  func.func @transform_0(%arg0: i32) -> (i32, i32) {
    %c0_i32 = arith.constant 0 : i32
    %c0_i32_0 = arith.constant 0 : i32
    return %arg0, %c0_i32 : i32, i32
  }
  func.func @transform_1(%arg0: i32) -> (i32, i32) {
    %c0_i32 = arith.constant 0 : i32
    %c0_i32_0 = arith.constant 0 : i32
    %c0_i32_1 = arith.constant 0 : i32
    return %c0_i32, %c0_i32_0 : i32, i32
  }
  func.func @transform_2(%arg0: i32) -> (i32, i32) {
    %c0_i32 = arith.constant 0 : i32
    %c0_i32_0 = arith.constant 0 : i32
    %c0_i32_1 = arith.constant 0 : i32
    return %c0_i32, %c0_i32_0 : i32, i32
  }
  func.func @transform_3(%arg0: i32) -> (i32, i32) {
    %c0_i32 = arith.constant 0 : i32
    %c0_i32_0 = arith.constant 0 : i32
    return %c0_i32, %arg0 : i32, i32
  }
}

</mosaic_0001>

<bundles_post_ra>
// kernel: tpu_custom_call.1
= control target key start
LH: loop header
LB: loop body
LE: loop exit
PB: predicated region body
PF: predicated region fallthrough
CT: control target
= control target key end

     0   :  { %8 = vsyncpa [#allocation3], 0  ;;  %s239_s0 = inlined_call_operand.hbm [shape: f32[16,32], index: 0, kind: input, shape index: {}]   ;;  %s240_s1 = inlined_call_operand.vmem [shape: f32[8,32], index: 1, kind: input, shape index: {}]   ;;  %s241_s2 = inlined_call_operand.vmem [shape: f32[8,1], index: 2, kind: input, shape index: {}]   ;;  %s242_s3 = inlined_call_operand.hbm [shape: f32[8,16], index: 3, kind: output, shape index: {}]  }
   0x1   :  { %9 = vsyncpa [#allocation4], 0  ;;  %s200_s12 = smov [#allocation2]  }
   0x2   :  { %s15_s13 = sshll.u32 %s200_s12, 4  ;;  %s16_s13 = int_to_ptr.vmem [resolvable:$true] %s15_s13 }
   0x3   :  { %s164_s14 = scalar_lea.vmem %s16_s13, 256  ;;  %p169_p1 = scmp.lt.s32.totalorder %s16_s13, %s16_s13 }
   0x4   :  { %p165_p0 = scmp.ne.s32.totalorder %s16_s13, %s164_s14  ;;  %p170_p2 = scmp.lt.s32.totalorder %s164_s14, %s164_s14 }
   0x6   :  { %p171_p3 = por %p170_p2, %p169_p1 }
   0x8   :  { %p172_p4 = pnand %p171_p3, %p165_p0 }
   0xa   :  { %175 = shalt.err (!%p172_p4)
}
   0xb   :  { %s201_s15 = smov 128   ;;  %s202_s16 = smov 8  }
   0xc   :  { %21 = dma.hbm_to_vmem [thread:$0]  %s239_s0, 256, %s16_s13, [#allocation3], %s201_s15, %s201_s15, %s202_s16  }
   0xd   :  { %196 = dma.done.wait [#allocation3], 256  }
   0xe   :  { %197 = vsyncadd [#allocation3], 4294967040  ;;  %v203_v0 = vmov 0.0   ;;  %vm204_vm0 = vmmov 0   ;;  %v205_v1 = vmov 0   ;;  %vm38_vm1 = vcmask 261120  }
   0xf   :  { %141 = vmatprep.subr.mxu0 %v203_v0  ;;  %145 = vmatprep.mubr.msk.f32.mxu0 %vm204_vm0, %v203_v0  ;;  %v30_v2 = vld [vmem:[#allocation2 + $0x8] sm:$0xff]  ;;  %v32_v3 = vld [vmem:[%s241_s2] sm:$0xff]  ;;  %s206_s22 = smov [#allocation5]   ;;  %vm118_vm2 = vcmask 130048  }
  0x10   :  { %155 = vset.pattern.permute.xlu0 %v205_v1  ;;  %142 = vmatpush3.xpose.msk.msra.mxu0 %vm38_vm1, %v30_v2  ;;  %v29_v4 = vld [vmem:[#allocation2] sm:$0xff]  ;;  %s126_s23 = sshll.u32 %s206_s22, 4  ;;  %s127_s23 = int_to_ptr.vmem [resolvable:$true] %s126_s23 }
  0x11   :  { %143 = vmatprep.subr.mxu0 %v203_v0  ;;  %35 = vperm.xlu0 %155, %v32_v3   ;;  %v31_v5 = vld [vmem:[%s240_s1] sm:$0xff]  ;;  %s176_s24 = scalar_lea.vmem %s127_s23, 128  ;;  %p181_p6 = scmp.lt.s32.totalorder %s127_s23, %s127_s23 }
  0x12   :  { %p177_p5 = scmp.ne.s32.totalorder %s127_s23, %s176_s24  ;;  %p182_p7 = scmp.lt.s32.totalorder %s176_s24, %s176_s24 }
  0x14   :  { %144 = vmatpush3.xpose.msk.msra.mxu0 %vm38_vm1, %v29_v4  ;;  %p183_p8 = por %p182_p7, %p181_p6 }
  0x16   :  { %p184_p9 = pnand %p183_p8, %p177_p5 }
  0x17   :  { %146 = vmatmul.mubr.msk.f32.vlgmr.msra.gmra.mxu0 %vm38_vm1, %v31_v5 }
  0x8c   :  { %v36_v6 = vpop.permute.xlu0 %35 }
  0xd7   :  { %v114_v7 = vpop.f32.mrf.mxu0 }
  0xd8   :  { %v115_v8 = vadd.f32 %v114_v7, %v36_v6 }
  0xd9   :  { %v147_v9 = vpop.f32.mrf.mxu0 }
  0xda   :  { %119 = vst.msk [vmem:[#allocation5] sm:$0xff] %vm118_vm2, %v115_v8 }
  0xdb   :  { %187 = shalt.err (!%p184_p9)
}
  0xdc   :  { %129 = dma.vmem_to_hbm [thread:$0]  %s127_s23, 128, %s242_s3, [#allocation4]  }
  0xdd   :  { %198 = dma.done.wait [#allocation4], 128  }
  0xde   :  { %199 = vsyncadd [#allocation4], 4294967168 }
  0xdf   :  { %133 = vsyncpa [#allocation3], 1 }
  0xe0   :  { %134 = vsyncpa [#allocation4], 1 }

// kernel: tpu_custom_call.1
= control target key start
LH: loop header
LB: loop body
LE: loop exit
PB: predicated region body
PF: predicated region fallthrough
CT: control target
= control target key end

     0   :  { %8 = vsyncpa [#allocation3], 0  ;;  %s239_s0 = inlined_call_operand.hbm [shape: f32[16,32], index: 0, kind: input, shape index: {}]   ;;  %s240_s1 = inlined_call_operand.vmem [shape: f32[8,32], index: 1, kind: input, shape index: {}]   ;;  %s241_s2 = inlined_call_operand.vmem [shape: f32[8,1], index: 2, kind: input, shape index: {}]   ;;  %s242_s3 = inlined_call_operand.hbm [shape: f32[8,16], index: 3, kind: output, shape index: {}]  }
   0x1   :  { %9 = vsyncpa [#allocation4], 0  ;;  %s200_s12 = smov [#allocation2]  }
   0x2   :  { %s15_s13 = sshll.u32 %s200_s12, 4  ;;  %s16_s13 = int_to_ptr.vmem [resolvable:$true] %s15_s13 }
   0x3   :  { %s164_s14 = scalar_lea.vmem %s16_s13, 256  ;;  %p169_p1 = scmp.lt.s32.totalorder %s16_s13, %s16_s13 }
   0x4   :  { %p165_p0 = scmp.ne.s32.totalorder %s16_s13, %s164_s14  ;;  %p170_p2 = scmp.lt.s32.totalorder %s164_s14, %s164_s14 }
   0x6   :  { %p171_p3 = por %p170_p2, %p169_p1 }
   0x8   :  { %p172_p4 = pnand %p171_p3, %p165_p0 }
   0xa   :  { %175 = shalt.err (!%p172_p4)
}
   0xb   :  { %s201_s15 = smov 128   ;;  %s202_s16 = smov 8  }
   0xc   :  { %21 = dma.hbm_to_vmem [thread:$0]  %s239_s0, 256, %s16_s13, [#allocation3], %s201_s15, %s201_s15, %s202_s16  }
   0xd   :  { %196 = dma.done.wait [#allocation3], 256  }
   0xe   :  { %197 = vsyncadd [#allocation3], 4294967040  ;;  %v203_v0 = vmov 0.0   ;;  %vm204_vm0 = vmmov 0   ;;  %v205_v1 = vmov 0   ;;  %vm38_vm1 = vcmask 261120  }
   0xf   :  { %141 = vmatprep.subr.mxu0 %v203_v0  ;;  %145 = vmatprep.mubr.msk.f32.mxu0 %vm204_vm0, %v203_v0  ;;  %v30_v2 = vld [vmem:[#allocation2 + $0x8] sm:$0xff]  ;;  %v32_v3 = vld [vmem:[%s241_s2] sm:$0xff]  ;;  %s206_s22 = smov [#allocation5]   ;;  %vm118_vm2 = vcmask 130048  }
  0x10   :  { %155 = vset.pattern.permute.xlu0 %v205_v1  ;;  %142 = vmatpush3.xpose.msk.msra.mxu0 %vm38_vm1, %v30_v2  ;;  %v29_v4 = vld [vmem:[#allocation2] sm:$0xff]  ;;  %s126_s23 = sshll.u32 %s206_s22, 4  ;;  %s127_s23 = int_to_ptr.vmem [resolvable:$true] %s126_s23 }
  0x11   :  { %143 = vmatprep.subr.mxu0 %v203_v0  ;;  %35 = vperm.xlu0 %155, %v32_v3   ;;  %v31_v5 = vld [vmem:[%s240_s1] sm:$0xff]  ;;  %s176_s24 = scalar_lea.vmem %s127_s23, 128  ;;  %p181_p6 = scmp.lt.s32.totalorder %s127_s23, %s127_s23 }
  0x12   :  { %p177_p5 = scmp.ne.s32.totalorder %s127_s23, %s176_s24  ;;  %p182_p7 = scmp.lt.s32.totalorder %s176_s24, %s176_s24 }
  0x14   :  { %144 = vmatpush3.xpose.msk.msra.mxu0 %vm38_vm1, %v29_v4  ;;  %p183_p8 = por %p182_p7, %p181_p6 }
  0x16   :  { %p184_p9 = pnand %p183_p8, %p177_p5 }
  0x17   :  { %146 = vmatmul.mubr.msk.f32.vlgmr.msra.gmra.mxu0 %vm38_vm1, %v31_v5 }
  0x8c   :  { %v36_v6 = vpop.permute.xlu0 %35 }
  0xd7   :  { %v114_v7 = vpop.f32.mrf.mxu0 }
  0xd8   :  { %v115_v8 = vadd.f32 %v114_v7, %v36_v6 }
  0xd9   :  { %v147_v9 = vpop.f32.mrf.mxu0 }
  0xda   :  { %119 = vst.msk [vmem:[#allocation5] sm:$0xff] %vm118_vm2, %v115_v8 }
  0xdb   :  { %187 = shalt.err (!%p184_p9)
}
  0xdc   :  { %129 = dma.vmem_to_hbm [thread:$0]  %s127_s23, 128, %s242_s3, [#allocation4]  }
  0xdd   :  { %198 = dma.done.wait [#allocation4], 128  }
  0xde   :  { %199 = vsyncadd [#allocation4], 4294967168 }
  0xdf   :  { %133 = vsyncpa [#allocation3], 1 }
  0xe0   :  { %134 = vsyncpa [#allocation4], 1 }

</bundles_post_ra>
